<compile_context>
chip_gen: v6e
topology: v6e:2x2x1
jax: 0.10.0
libtpu: 0.0.40
codegen_flags: <defaults>
</compile_context>

<pallas_src>
import math

import jax
import jax.numpy as jnp
from jax import lax
from jax.experimental import pallas as pl
from jax.experimental.pallas import tpu as pltpu


def _choose_q_tile(S: int) -> int:
    """Largest legal query-row tile: full S (always a legal full-extent block)
    up to 512 rows, otherwise the biggest multiple-of-8 divisor."""
    if S <= 512:
        return S
    for cand in (512, 256, 128, 64, 32, 16, 8):
        if S % cand == 0:
            return cand
    return S  # TODO(synk): pad S for very long, non-divisible sequences


# ----------------------------------------------------------------------------
# Fused kernel: masked cross attention (encoder stand-in, K/V cached per batch)
#               + concat-free Linear(2D -> D) + ReLU epilogue.
# ----------------------------------------------------------------------------
def fused_cross_attention_kernel(trj_ref, vsn_ref, kbias_ref, qmask_ref,
                                 wq_ref, wk_ref, wv_ref,
                                 w1_ref, w2_ref, b_ref,
                                 out_ref,
                                 k_scr, v_scr):
    # Per grid step (b, qi):
    #   trj_ref  : (1, tq, D)  query-side activations (also the "mix" output)
    #   vsn_ref  : (1, S,  D)  key/value-side activations (resident per batch)
    #   kbias_ref: (1, 1,  S)  additive key-mask bias (0 keep / -1e9 drop)
    #   qmask_ref: (1, tq, 1)  multiplicative query mask (1 keep / 0 drop)
    #   wq/wk/wv : (D, D)      encoder projections (wq pre-scaled, resident)
    #   w1/w2    : (D, D)      fc_ws weight split (resident)
    #   b_ref    : (1, D)      fc_ws bias
    #   out_ref  : (1, tq, D)
    #   k_scr/v_scr : (S, D)   VMEM-cached K / V for the current batch element
    qi = pl.program_id(1)
    cdt = wq_ref.dtype                    # matmul compute dtype (f32 or bf16)

    # ---- K/V projections: computed once per batch element, reused per tile --
    @pl.when(qi == 0)
    def _():
        vsn = vsn_ref[0].astype(cdt)                                    # (S, D)
        k_scr[...] = jnp.dot(vsn, wk_ref[...],
                             preferred_element_type=jnp.float32).astype(cdt)
        v_scr[...] = jnp.dot(vsn, wv_ref[...],
                             preferred_element_type=jnp.float32).astype(cdt)

    trj = trj_ref[0]                                                    # (tq, D)

    # Q projection (1/sqrt(D) already folded into wq in the wrapper).
    q = jnp.dot(trj.astype(cdt), wq_ref[...],
                preferred_element_type=jnp.float32)                     # (tq, D)

    # logits = q @ K.T  -> (tq, S), plus additive key-mask bias (f32).
    logits = lax.dot_general(
        q.astype(cdt), k_scr[...],
        (((1,), (1,)), ((), ())),
        preferred_element_type=jnp.float32)
    logits = logits + kbias_ref[0]                      # (1, S) bcast over rows

    # Numerically stable softmax (exp on the EUP, reductions on the XLU).
    m = jnp.max(logits, axis=-1, keepdims=True)
    p = jnp.exp(logits - m)
    denom = jnp.sum(p, axis=-1, keepdims=True)
    if cdt == jnp.bfloat16:
        # EUP approximate reciprocal (free bundle slot) on the fast path.
        attn = p * pl.reciprocal(denom, approx=True)
    else:
        attn = p / denom                                # exact f32 path

    code = jnp.dot(attn.astype(cdt), v_scr[...],
                   preferred_element_type=jnp.float32)  # (tq, D)
    code = code * qmask_ref[0]                          # zero masked query rows
    mix = trj                                           # encoder's 2nd output

    # ---- fc_ws epilogue: relu(concat([code, mix]) @ W.T + b) ----------------
    # concat-free: relu(code @ W1 + mix @ W2 + b) with W = [W1 ; W2]
    acc = jnp.dot(code.astype(cdt), w1_ref[...],
                  preferred_element_type=jnp.float32)
    acc = acc + jnp.dot(mix.astype(cdt), w2_ref[...],
                        preferred_element_type=jnp.float32)
    acc = acc + b_ref[...]                              # (1, D) bias broadcast
    out_ref[0] = jnp.maximum(acc, 0.0).astype(out_ref.dtype)


def cross_attention_layer_pallas(src_trj, src_vsn, src_mask, obd_enc_mask,
                                 params, *, compute_dtype=jnp.float32,
                                 q_tile=None):
    """Fused CrossAttentionLayer.forward.

    src_trj, src_vsn : (B, S, D) float32
    src_mask         : (B, S) bool  (True = keep query row of `code`)
    obd_enc_mask     : (B, S) bool  (True = keep key/value position)
    params["fc_w"]   : (D, 2*D) PyTorch nn.Linear weight (out_features, in_features)
    params["fc_b"]   : (D,)
    compute_dtype    : jnp.float32 (exact) or jnp.bfloat16 (v6e/v7x MXU path,
                       f32 accumulation; softmax/bias/ReLU stay f32)
    q_tile           : optional query-row tile override (multiple of 8 or == S)
    """
    B, S, D = src_trj.shape
    tq = q_tile if q_tile is not None else _choose_q_tile(S)
    n_q = pl.cdiv(S, tq)

    # Mask preprocessing (key/feature axis last -> lane axis).
    kbias = jnp.where(obd_enc_mask, 0.0, -1e9).astype(jnp.float32).reshape(B, 1, S)
    qmask = src_mask.astype(jnp.float32).reshape(B, S, 1)

    # fc_ws weight: split along the input dim and pre-transpose so the kernel
    # never materializes the concat in HBM or VMEM.
    w_pt = params["fc_w"]
    w1 = jnp.transpose(w_pt[:, :D]).astype(compute_dtype)   # (D, D)
    w2 = jnp.transpose(w_pt[:, D:]).astype(compute_dtype)   # (D, D)
    bias = params["fc_b"].reshape(1, D).astype(jnp.float32)

    # Attention scale folded into wq (done once here, never per-tile).
    scale = 1.0 / math.sqrt(D)
    wq = (params["wq"] * scale).astype(compute_dtype)
    wk = params["wk"].astype(compute_dtype)
    wv = params["wv"].astype(compute_dtype)

    cost = pl.CostEstimate(
        flops=int(2 * B * S * D * D                    # Q projection (all rows)
                  + 2 * B * S * D * D * 2              # K/V (once per batch)
                  + 2 * B * S * S * D * 2              # logits + PV
                  + 2 * B * S * (2 * D) * D),          # fc_ws
        transcendentals=int(B * S * S),                # exp
        bytes_accessed=int(4 * (3 * B * S * D + 2 * B * S + 5 * D * D + D)),
    )

    grid_spec = pltpu.PrefetchScalarGridSpec(
        num_scalar_prefetch=0,
        grid=(B, n_q),
        in_specs=[
            pl.BlockSpec((1, tq, D), lambda b, qi: (b, qi, 0)),   # src_trj / mix
            pl.BlockSpec((1, S, D), lambda b, qi: (b, 0, 0)),     # src_vsn (full K/V src)
            pl.BlockSpec((1, 1, S), lambda b, qi: (b, 0, 0)),     # key-mask bias
            pl.BlockSpec((1, tq, 1), lambda b, qi: (b, qi, 0)),   # query mask
            pl.BlockSpec((D, D), lambda b, qi: (0, 0)),           # wq (resident)
            pl.BlockSpec((D, D), lambda b, qi: (0, 0)),           # wk (resident)
            pl.BlockSpec((D, D), lambda b, qi: (0, 0)),           # wv (resident)
            pl.BlockSpec((D, D), lambda b, qi: (0, 0)),           # W1 (resident)
            pl.BlockSpec((D, D), lambda b, qi: (0, 0)),           # W2 (resident)
            pl.BlockSpec((1, D), lambda b, qi: (0, 0)),           # bias (resident)
        ],
        out_specs=pl.BlockSpec((1, tq, D), lambda b, qi: (b, qi, 0)),
        scratch_shapes=[
            pltpu.VMEM((S, D), compute_dtype),   # cached K for current batch
            pltpu.VMEM((S, D), compute_dtype),   # cached V for current batch
        ],
    )

    out = pl.pallas_call(
        fused_cross_attention_kernel,
        out_shape=jax.ShapeDtypeStruct((B, S, D), src_trj.dtype),
        grid_spec=grid_spec,
        compiler_params=pltpu.CompilerParams(
            # qi carries the K/V scratch cache -> "arbitrary"; batch is parallel.
            dimension_semantics=("parallel", "arbitrary")),
        cost_estimate=cost,
    )(src_trj, src_vsn, kbias, qmask, wq, wk, wv, w1, w2, bias)
    return out


# ----------------------------------------------------------------------------
# Plain-JAX reference (encoder stand-in + concat + Linear + ReLU)
# ----------------------------------------------------------------------------
def encoder_reference(src_trj, src_vsn, src_mask, obd_enc_mask, params):
    D = src_trj.shape[-1]
    q = src_trj @ params["wq"]
    k = src_vsn @ params["wk"]
    v = src_vsn @ params["wv"]
    logits = jnp.einsum("bqd,bkd->bqk", q, k) / jnp.sqrt(jnp.float32(D))
    logits = logits + jnp.where(obd_enc_mask[:, None, :], 0.0, -1e9)
    attn = jax.nn.softmax(logits, axis=-1)
    code = jnp.einsum("bqk,bkd->bqd", attn, v)
    code = jnp.where(src_mask[:, :, None], code, 0.0)
    mix = src_trj
    return code, mix


def reference(src_trj, src_vsn, src_mask, obd_enc_mask, params):
    code, mix = encoder_reference(src_trj, src_vsn, src_mask, obd_enc_mask, params)
    code_cat = jnp.concatenate([code, mix], axis=-1)
    return jax.nn.relu(code_cat @ params["fc_w"].T + params["fc_b"])


def _make_inputs(key, B, S, D):
    k_trj, k_vsn, k_wq, k_wk, k_wv, k_fw, k_fb = jax.random.split(key, 7)
    src_trj = jax.random.normal(k_trj, (B, S, D), dtype=jnp.float32)
    src_vsn = jax.random.normal(k_vsn, (B, S, D), dtype=jnp.float32)
    # masks: True = keep, last position of each sequence is masked out
    src_mask = jnp.ones((B, S), dtype=bool).at[:, -1].set(False)
    obd_enc_mask = jnp.ones((B, S), dtype=bool).at[:, -1].set(False)
    scale = 1.0 / jnp.sqrt(jnp.float32(D))
    params = {
        # encoder stand-in params
        "wq": jax.random.normal(k_wq, (D, D), dtype=jnp.float32) * scale,
        "wk": jax.random.normal(k_wk, (D, D), dtype=jnp.float32) * scale,
        "wv": jax.random.normal(k_wv, (D, D), dtype=jnp.float32) * scale,
        # fc_ws = nn.Linear(2*D, D): weight (D, 2*D), bias (D,)
        "fc_w": jax.random.normal(k_fw, (D, 2 * D), dtype=jnp.float32)
        * (1.0 / jnp.sqrt(jnp.float32(2 * D))),
        "fc_b": jax.random.normal(k_fb, (D,), dtype=jnp.float32) * 0.01,
    }
    return src_trj, src_vsn, src_mask, obd_enc_mask, params


if __name__ == "__main__":
    key = jax.random.PRNGKey(0)

    # --- Test 1: single query tile (tq == S), exact f32 path -----------------
    B, S, D = 2, 8, 32
    src_trj, src_vsn, src_mask, obd_enc_mask, params = _make_inputs(key, B, S, D)
    ref = reference(src_trj, src_vsn, src_mask, obd_enc_mask, params)

    out = cross_attention_layer_pallas(src_trj, src_vsn, src_mask,
                                       obd_enc_mask, params)
    out = jax.block_until_ready(out)
    assert out.shape == (B, S, D)
    assert jnp.allclose(out, ref, atol=1e-5, rtol=1e-5), "Pallas f32 mismatch"

    # --- Test 2: bf16 MXU path (v6e/v7x optimization), loose check -----------
    out_bf16 = cross_attention_layer_pallas(src_trj, src_vsn, src_mask,
                                            obd_enc_mask, params,
                                            compute_dtype=jnp.bfloat16)
    out_bf16 = jax.block_until_ready(out_bf16)
    assert out_bf16.shape == (B, S, D)
    assert bool(jnp.all(jnp.isfinite(out_bf16)))
    assert float(jnp.max(jnp.abs(out_bf16 - ref))) < 0.5, "Pallas bf16 mismatch"

    # --- Test 3: multi query tile -> exercises the cached K/V + pl.when path -
    B2, S2, D2 = 2, 16, 32
    key2 = jax.random.PRNGKey(1)
    t_trj, t_vsn, t_qm, t_km, t_params = _make_inputs(key2, B2, S2, D2)
    ref2 = reference(t_trj, t_vsn, t_qm, t_km, t_params)
    out2 = cross_attention_layer_pallas(t_trj, t_vsn, t_qm, t_km, t_params,
                                        q_tile=8)   # n_q = 2
    out2 = jax.block_until_ready(out2)
    assert out2.shape == (B2, S2, D2)
    assert jnp.allclose(out2, ref2, atol=1e-5, rtol=1e-5), \
        "Pallas f32 multi-tile mismatch"

    print("KERNEL_OK")
</pallas_src>

<mosaic_0001>
module attributes {stable_mosaic.version = 11 : i64} {
  func.func @fused_cross_attention_kernel(%arg0: i32, %arg1: i32, %arg2: memref<1x8x32xf32, #tpu.memory_space<vmem>>, %arg3: memref<1x8x32xf32, #tpu.memory_space<vmem>>, %arg4: memref<1x1x8xf32, #tpu.memory_space<vmem>>, %arg5: memref<1x8x1xf32, #tpu.memory_space<vmem>>, %arg6: memref<32x32xf32, #tpu.memory_space<vmem>>, %arg7: memref<32x32xf32, #tpu.memory_space<vmem>>, %arg8: memref<32x32xf32, #tpu.memory_space<vmem>>, %arg9: memref<32x32xf32, #tpu.memory_space<vmem>>, %arg10: memref<32x32xf32, #tpu.memory_space<vmem>>, %arg11: memref<1x32xf32, #tpu.memory_space<vmem>>, %arg12: memref<1x8x32xf32, #tpu.memory_space<vmem>>, %arg13: memref<8x32xf32, #tpu.memory_space<vmem>>, %arg14: memref<8x32xf32, #tpu.memory_space<vmem>>) attributes {dimension_semantics = [#tpu.dimension_semantics<parallel>, #tpu.dimension_semantics<arbitrary>], iteration_bounds = array<i64: 2, 1>, scalar_prefetch = 0 : i64, scratch_operands = 2 : i64, tpu.core_type = #tpu.core_type<tc>, window_params = [{transform_indices = @transform_0, window_bounds = array<i64: 1, 8, 32>}, {transform_indices = @transform_1, window_bounds = array<i64: 1, 8, 32>}, {transform_indices = @transform_2, window_bounds = array<i64: 1, 1, 8>}, {transform_indices = @transform_3, window_bounds = array<i64: 1, 8, 1>}, {pipeline_mode = #tpu.pipeline_mode<synchronous>, transform_indices = @transform_4, window_bounds = array<i64: 32, 32>}, {pipeline_mode = #tpu.pipeline_mode<synchronous>, transform_indices = @transform_5, window_bounds = array<i64: 32, 32>}, {pipeline_mode = #tpu.pipeline_mode<synchronous>, transform_indices = @transform_6, window_bounds = array<i64: 32, 32>}, {pipeline_mode = #tpu.pipeline_mode<synchronous>, transform_indices = @transform_7, window_bounds = array<i64: 32, 32>}, {pipeline_mode = #tpu.pipeline_mode<synchronous>, transform_indices = @transform_8, window_bounds = array<i64: 32, 32>}, {pipeline_mode = #tpu.pipeline_mode<synchronous>, transform_indices = @transform_9, window_bounds = array<i64: 1, 32>}, {transform_indices = @transform_10, window_bounds = array<i64: 1, 8, 32>}]} {
    %c0_i32 = arith.constant 0 : i32
    %0 = arith.cmpi eq, %arg1, %c0_i32 : i32
    %1 = arith.extui %0 : i1 to i32
    %c0_i32_0 = arith.constant 0 : i32
    %2 = arith.cmpi ne, %1, %c0_i32_0 : i32
    scf.if %2 {
      %c0_31 = arith.constant 0 : index
      %c0_32 = arith.constant 0 : index
      %c0_33 = arith.constant 0 : index
      %41 = vector.load %arg3[%c0_31, %c0_32, %c0_33] : memref<1x8x32xf32, #tpu.memory_space<vmem>>, vector<1x8x32xf32>
      %42 = vector.shape_cast %41 : vector<1x8x32xf32> to vector<8x32xf32>
      %c0_34 = arith.constant 0 : index
      %c0_35 = arith.constant 0 : index
      %43 = vector.load %arg7[%c0_34, %c0_35] : memref<32x32xf32, #tpu.memory_space<vmem>>, vector<32x32xf32>
      %cst_36 = arith.constant dense<0.000000e+00> : vector<8x32xf32>
      %44 = tpu.matmul %42, %43, %cst_36 {dimension_numbers = #tpu.dot_dimension_numbers<[1], [0], [0], [1], [0, 0, 1, 1], [], []>} : vector<8x32xf32>, vector<32x32xf32>, vector<8x32xf32> -> vector<8x32xf32>
      %c0_37 = arith.constant 0 : index
      %c0_38 = arith.constant 0 : index
      %45 = vector.load %arg13[%c0_37, %c0_38] : memref<8x32xf32, #tpu.memory_space<vmem>>, vector<8x32xf32>
      tpu.vector_store %arg13[%c0_37, %c0_38], %44 {strides = array<i32>} : memref<8x32xf32, #tpu.memory_space<vmem>>, vector<8x32xf32>,
      %c0_39 = arith.constant 0 : index
      %c0_40 = arith.constant 0 : index
      %46 = vector.load %arg8[%c0_39, %c0_40] : memref<32x32xf32, #tpu.memory_space<vmem>>, vector<32x32xf32>
      %cst_41 = arith.constant dense<0.000000e+00> : vector<8x32xf32>
      %47 = tpu.matmul %42, %46, %cst_41 {dimension_numbers = #tpu.dot_dimension_numbers<[1], [0], [0], [1], [0, 0, 1, 1], [], []>} : vector<8x32xf32>, vector<32x32xf32>, vector<8x32xf32> -> vector<8x32xf32>
      %c0_42 = arith.constant 0 : index
      %c0_43 = arith.constant 0 : index
      %48 = vector.load %arg14[%c0_42, %c0_43] : memref<8x32xf32, #tpu.memory_space<vmem>>, vector<8x32xf32>
      tpu.vector_store %arg14[%c0_42, %c0_43], %47 {strides = array<i32>} : memref<8x32xf32, #tpu.memory_space<vmem>>, vector<8x32xf32>,
    } else {
    }
    %c0 = arith.constant 0 : index
    %c0_1 = arith.constant 0 : index
    %c0_2 = arith.constant 0 : index
    %3 = vector.load %arg2[%c0, %c0_1, %c0_2] : memref<1x8x32xf32, #tpu.memory_space<vmem>>, vector<1x8x32xf32>
    %4 = vector.shape_cast %3 : vector<1x8x32xf32> to vector<8x32xf32>
    %c0_3 = arith.constant 0 : index
    %c0_4 = arith.constant 0 : index
    %5 = vector.load %arg6[%c0_3, %c0_4] : memref<32x32xf32, #tpu.memory_space<vmem>>, vector<32x32xf32>
    %cst = arith.constant dense<0.000000e+00> : vector<8x32xf32>
    %6 = tpu.matmul %4, %5, %cst {dimension_numbers = #tpu.dot_dimension_numbers<[1], [0], [0], [1], [0, 0, 1, 1], [], []>} : vector<8x32xf32>, vector<32x32xf32>, vector<8x32xf32> -> vector<8x32xf32>
    %c0_5 = arith.constant 0 : index
    %c0_6 = arith.constant 0 : index
    %7 = vector.load %arg13[%c0_5, %c0_6] : memref<8x32xf32, #tpu.memory_space<vmem>>, vector<8x32xf32>
    %cst_7 = arith.constant dense<0.000000e+00> : vector<8x8xf32>
    %8 = tpu.matmul %6, %7, %cst_7 {dimension_numbers = #tpu.dot_dimension_numbers<[1], [1], [0], [0], [0, 0, 1, 0], [], []>} : vector<8x32xf32>, vector<8x32xf32>, vector<8x8xf32> -> vector<8x8xf32>
    %c0_8 = arith.constant 0 : index
    %c0_9 = arith.constant 0 : index
    %c0_10 = arith.constant 0 : index
    %9 = vector.load %arg4[%c0_8, %c0_9, %c0_10] : memref<1x1x8xf32, #tpu.memory_space<vmem>>, vector<1x1x8xf32>
    %10 = vector.shape_cast %9 : vector<1x1x8xf32> to vector<1x8xf32>
    %11 = vector.broadcast %10 : vector<1x8xf32> to vector<8x8xf32>
    %12 = arith.addf %8, %11 : vector<8x8xf32>
    %cst_11 = arith.constant dense<0xFF800000> : vector<8xf32>
    %13 = vector.multi_reduction <maximumf>, %12, %cst_11 [1] : vector<8x8xf32> to vector<8xf32>
    %14 = vector.shape_cast %13 : vector<8xf32> to vector<8x1xf32>
    %15 = vector.broadcast %14 : vector<8x1xf32> to vector<8x8xf32>
    %16 = arith.subf %12, %15 : vector<8x8xf32>
    %17 = math.exp %16 : vector<8x8xf32>
    %cst_12 = arith.constant dense<0.000000e+00> : vector<8xf32>
    %18 = vector.multi_reduction <add>, %17, %cst_12 [1] : vector<8x8xf32> to vector<8xf32>
    %19 = vector.shape_cast %18 : vector<8xf32> to vector<8x1xf32>
    %20 = vector.broadcast %19 : vector<8x1xf32> to vector<8x8xf32>
    %21 = arith.divf %17, %20 : vector<8x8xf32>
    %c0_13 = arith.constant 0 : index
    %c0_14 = arith.constant 0 : index
    %22 = vector.load %arg14[%c0_13, %c0_14] : memref<8x32xf32, #tpu.memory_space<vmem>>, vector<8x32xf32>
    %cst_15 = arith.constant dense<0.000000e+00> : vector<8x32xf32>
    %23 = tpu.matmul %21, %22, %cst_15 {dimension_numbers = #tpu.dot_dimension_numbers<[1], [0], [0], [1], [0, 0, 1, 1], [], []>} : vector<8x8xf32>, vector<8x32xf32>, vector<8x32xf32> -> vector<8x32xf32>
    %c0_16 = arith.constant 0 : index
    %c0_17 = arith.constant 0 : index
    %c0_18 = arith.constant 0 : index
    %24 = vector.load %arg5[%c0_16, %c0_17, %c0_18] : memref<1x8x1xf32, #tpu.memory_space<vmem>>, vector<1x8x1xf32>
    %25 = vector.shape_cast %24 : vector<1x8x1xf32> to vector<8x1xf32>
    %26 = vector.broadcast %25 : vector<8x1xf32> to vector<8x32xf32>
    %27 = arith.mulf %23, %26 : vector<8x32xf32>
    %c0_19 = arith.constant 0 : index
    %c0_20 = arith.constant 0 : index
    %28 = vector.load %arg9[%c0_19, %c0_20] : memref<32x32xf32, #tpu.memory_space<vmem>>, vector<32x32xf32>
    %cst_21 = arith.constant dense<0.000000e+00> : vector<8x32xf32>
    %29 = tpu.matmul %27, %28, %cst_21 {dimension_numbers = #tpu.dot_dimension_numbers<[1], [0], [0], [1], [0, 0, 1, 1], [], []>} : vector<8x32xf32>, vector<32x32xf32>, vector<8x32xf32> -> vector<8x32xf32>
    %c0_22 = arith.constant 0 : index
    %c0_23 = arith.constant 0 : index
    %30 = vector.load %arg10[%c0_22, %c0_23] : memref<32x32xf32, #tpu.memory_space<vmem>>, vector<32x32xf32>
    %cst_24 = arith.constant dense<0.000000e+00> : vector<8x32xf32>
    %31 = tpu.matmul %4, %30, %cst_24 {dimension_numbers = #tpu.dot_dimension_numbers<[1], [0], [0], [1], [0, 0, 1, 1], [], []>} : vector<8x32xf32>, vector<32x32xf32>, vector<8x32xf32> -> vector<8x32xf32>
    %32 = arith.addf %29, %31 : vector<8x32xf32>
    %c0_25 = arith.constant 0 : index
    %c0_26 = arith.constant 0 : index
    %33 = vector.load %arg11[%c0_25, %c0_26] : memref<1x32xf32, #tpu.memory_space<vmem>>, vector<1x32xf32>
    %34 = vector.broadcast %33 : vector<1x32xf32> to vector<8x32xf32>
    %35 = arith.addf %32, %34 : vector<8x32xf32>
    %cst_27 = arith.constant 0.000000e+00 : f32
    %36 = vector.broadcast %cst_27 : f32 to vector<8x32xf32>
    %37 = arith.maximumf %35, %36 : vector<8x32xf32>
    %c0_28 = arith.constant 0 : index
    %c0_29 = arith.constant 0 : index
    %c0_30 = arith.constant 0 : index
    %38 = vector.load %arg12[%c0_28, %c0_29, %c0_30] : memref<1x8x32xf32, #tpu.memory_space<vmem>>, vector<1x8x32xf32>
    %39 = vector.shape_cast %38 : vector<1x8x32xf32> to vector<8x32xf32>
    %40 = vector.shape_cast %37 : vector<8x32xf32> to vector<1x8x32xf32>
    tpu.vector_store %arg12[%c0_28, %c0_29, %c0_30], %40 {strides = array<i32>} : memref<1x8x32xf32, #tpu.memory_space<vmem>>, vector<1x8x32xf32>,
    return
  }
  func.func @transform_0(%arg0: i32, %arg1: i32) -> (i32, i32, i32) {
    %c0_i32 = arith.constant 0 : i32
    %c0_i32_0 = arith.constant 0 : i32
    return %arg0, %arg1, %c0_i32 : i32, i32, i32
  }
  func.func @transform_1(%arg0: i32, %arg1: i32) -> (i32, i32, i32) {
    %c0_i32 = arith.constant 0 : i32
    %c0_i32_0 = arith.constant 0 : i32
    %c0_i32_1 = arith.constant 0 : i32
    return %arg0, %c0_i32, %c0_i32_0 : i32, i32, i32
  }
  func.func @transform_2(%arg0: i32, %arg1: i32) -> (i32, i32, i32) {
    %c0_i32 = arith.constant 0 : i32
    %c0_i32_0 = arith.constant 0 : i32
    %c0_i32_1 = arith.constant 0 : i32
    return %arg0, %c0_i32, %c0_i32_0 : i32, i32, i32
  }
  func.func @transform_3(%arg0: i32, %arg1: i32) -> (i32, i32, i32) {
    %c0_i32 = arith.constant 0 : i32
    %c0_i32_0 = arith.constant 0 : i32
    return %arg0, %arg1, %c0_i32 : i32, i32, i32
  }
  func.func @transform_4(%arg0: i32, %arg1: i32) -> (i32, i32) {
    %c0_i32 = arith.constant 0 : i32
    %c0_i32_0 = arith.constant 0 : i32
    %c0_i32_1 = arith.constant 0 : i32
    return %c0_i32, %c0_i32_0 : i32, i32
  }
  func.func @transform_5(%arg0: i32, %arg1: i32) -> (i32, i32) {
    %c0_i32 = arith.constant 0 : i32
    %c0_i32_0 = arith.constant 0 : i32
    %c0_i32_1 = arith.constant 0 : i32
    return %c0_i32, %c0_i32_0 : i32, i32
  }
  func.func @transform_6(%arg0: i32, %arg1: i32) -> (i32, i32) {
    %c0_i32 = arith.constant 0 : i32
    %c0_i32_0 = arith.constant 0 : i32
    %c0_i32_1 = arith.constant 0 : i32
    return %c0_i32, %c0_i32_0 : i32, i32
  }
  func.func @transform_7(%arg0: i32, %arg1: i32) -> (i32, i32) {
    %c0_i32 = arith.constant 0 : i32
    %c0_i32_0 = arith.constant 0 : i32
    %c0_i32_1 = arith.constant 0 : i32
    return %c0_i32, %c0_i32_0 : i32, i32
  }
  func.func @transform_8(%arg0: i32, %arg1: i32) -> (i32, i32) {
    %c0_i32 = arith.constant 0 : i32
    %c0_i32_0 = arith.constant 0 : i32
    %c0_i32_1 = arith.constant 0 : i32
    return %c0_i32, %c0_i32_0 : i32, i32
  }
  func.func @transform_9(%arg0: i32, %arg1: i32) -> (i32, i32) {
    %c0_i32 = arith.constant 0 : i32
    %c0_i32_0 = arith.constant 0 : i32
    %c0_i32_1 = arith.constant 0 : i32
    return %c0_i32, %c0_i32_0 : i32, i32
  }
  func.func @transform_10(%arg0: i32, %arg1: i32) -> (i32, i32, i32) {
    %c0_i32 = arith.constant 0 : i32
    %c0_i32_0 = arith.constant 0 : i32
    return %arg0, %arg1, %c0_i32 : i32, i32, i32
  }
}

</mosaic_0001>

<bundles_post_ra>
// kernel: tpu_custom_call.1
= control target key start
LH: loop header
LB: loop body
LE: loop exit
PB: predicated region body
PF: predicated region fallthrough
CT: control target
= control target key end

     0   :  { %s2244_s0 = inlined_call_operand.hbm [shape: f32[2,8,32], index: 0, kind: input, shape index: {}]   ;;  %s2245_s1 = inlined_call_operand.hbm [shape: f32[2,8,32], index: 1, kind: input, shape index: {}]   ;;  %s2246_s2 = inlined_call_operand.hbm [shape: f32[2,1,8], index: 2, kind: input, shape index: {}]   ;;  %s2247_s3 = inlined_call_operand.vmem [shape: f32[2,8,1], index: 3, kind: input, shape index: {}]   ;;  %s2248_s4 = inlined_call_operand.hbm [shape: f32[32,32], index: 4, kind: input, shape index: {}]   ;;  %s2249_s5 = inlined_call_operand.hbm [shape: f32[32,32], index: 5, kind: input, shape index: {}]   ;;  %s2250_s6 = inlined_call_operand.hbm [shape: f32[32,32], index: 6, kind: input, shape index: {}]   ;;  %s2251_s7 = inlined_call_operand.hbm [shape: f32[32,32], index: 7, kind: input, shape index: {}]   ;;  %s2252_s8 = inlined_call_operand.vmem [shape: f32[32,32], index: 8, kind: input, shape index: {}]   ;;  %s2253_s9 = inlined_call_operand.vmem [shape: f32[1,32], index: 9, kind: input, shape index: {}]   ;;  %s2254_s10 = inlined_call_operand.hbm [shape: f32[2,8,32], index: 10, kind: output, shape index: {}]  }
   0x1   :  { %2271 = sst [smem:[#allocation28_spill]] %s2245_s1 }
   0x2   :  { %2272 = sst [smem:[#allocation29_spill]] %s2248_s4 }
   0x3   :  { %2273 = sst [smem:[#allocation30_spill]] %s2249_s5 }
   0x4   :  { %2274 = sst [smem:[#allocation31_spill]] %s2250_s6 }
   0x5   :  { %2275 = sst [smem:[#allocation32_spill]] %s2254_s10 }
   0x6   :  { %15 = vsyncpa [#allocation5], 0 }
   0x7   :  { %17 = vsyncpa [#allocation5 + $0x1], 0 }
   0x8   :  { %18 = vsyncpa [#allocation8], 0 }
   0x9   :  { %20 = vsyncpa [#allocation8 + $0x1], 0 }
   0xa   :  { %21 = vsyncpa [#allocation11], 0 }
   0xb   :  { %22 = vsyncpa [#allocation14], 0 }
   0xc   :  { %23 = vsyncpa [#allocation6], 0 }
   0xd   :  { %25 = vsyncpa [#allocation6 + $0x1], 0  ;;  %s1914_s13 = smov 0   ;;  %s1916_s14 = smov 0  }
   0xe   :  { %s1918_s15 = smov 0   ;;  %s1920_s16 = smov 0  }
   0xf   :  { %s1922_s17 = smov 0   ;;  %s1924_s18 = smov 0  }
  0x10 LB: > { %2276 = sst [smem:[#allocation22_spill]] %s1824_s13  ;;  %s1945_s19 = sadd.s32 4294967295, %s1844_s18   ;;  %s1844_s18 = sphi %s1924_s18, %s31_s18   ;;  %s1840_s17 = sphi %s1922_s17, %s2317_s17   ;;  %s1836_s16 = sphi %s1920_s16, %s2316_s16   ;;  %s1832_s15 = sphi %s1918_s15, %s2312_s15   ;;  %s1828_s14 = sphi %s1916_s14, %s2315_s14   ;;  %s1824_s13 = sphi %s1914_s13, %s2314_s13  }
  0x11   : > { %2277 = sst [smem:[#allocation23_spill]] %s1832_s15  ;;  %p1312_p0 = scmp.ge.s32.totalorder %s1844_s18, 1 }
  0x12   : > { %2278 = sst [smem:[#allocation24_spill]] %s1844_s18  ;;  %p2259_p1 = scmp.eq.s32.totalorder %s1945_s19, 0 }
  0x13   : > { %p310_p2 = scmp.lt.s32.totalorder %s1844_s18, 3  ;;  %s1846_s21 = smov [#allocation10]  }
  0x14   : > { %s322_s22 = sshll.u32 %s1846_s21, 4  ;;  %s1847_s24 = smov [#allocation13]   ;;  %s323_s22 = int_to_ptr.vmem [resolvable:$true] %s322_s22 }
  0x15   : > { %p1950_p3 = pnand %p1312_p0, %p310_p2  ;;  %s348_s25 = sshll.u32 %s1847_s24, 4  ;;  %s349_s25 = int_to_ptr.vmem [resolvable:$true] %s348_s25 }
  0x16   : > { %s1575_s26 = scalar_lea.vmem %s323_s22, 512  ;;  %p1583_p11 = scmp.lt.s32.totalorder %s323_s22, %s323_s22 }
  0x17   : > { %p1464_p4 = pneg %p1950_p3  ;;  %p1576_p8 = scmp.ne.s32.totalorder %s323_s22, %s1575_s26 }
  0x18   : > { %p1584_p12 = scmp.lt.s32.totalorder %s1575_s26, %s1575_s26 }
  0x19   : > { %p1959_p6 = pnand %p1464_p4, %p2259_p1 }
  0x1a   : > { %p1585_p13 = por %p1584_p12, %p1583_p11 }
  0x1b   : > { %p2267_p7 = pneg %p1959_p6 }
  0x1d   : > { %p1578_p9 = pnand %p1576_p8, %p2267_p7 }
  0x1f   : > { %p1579_p10 = pneg %p1578_p9 }
  0x21   : > { %p1586_p0 = pnand %p1585_p13, %p1579_p10 }
  0x23   : > { %1589 = shalt.err (!%p1586_p0)
}
  0x24   : > { %s2255_s27 = smov 128   ;;  %s2257_s28 = smov 8  }
  0x25   : > { %s2281_s4 = sld [smem:[#allocation29_spill]]  ;;  %s1601_s11 = scalar_lea.vmem %s349_s25, 512 }
  0x26   : > { %p1602_p2 = scmp.ne.s32.totalorder %s349_s25, %s1601_s11  ;;  %p1609_p9 = scmp.lt.s32.totalorder %s349_s25, %s349_s25 }
  0x27   : > { %p1610_p10 = scmp.lt.s32.totalorder %s1601_s11, %s1601_s11 }
  0x28   : > { %p1604_p4 = pnand %p1602_p2, %p2267_p7 }
  0x29   : > { %p1611_p11 = por %p1610_p10, %p1609_p9 }
  0x2a   : > { %p1605_p8 = pneg %p1604_p4 }
  0x2b   : > { %1467 = dma.hbm_to_vmem [thread:$0]  (!%p1959_p6), %s2281_s4, 512, %s323_s22, [#allocation11], %s2255_s27, %s2255_s27, %s2257_s28  }
  0x2c   : > { %p1612_p12 = pnand %p1611_p11, %p1605_p8 }
  0x2e   : > { %1615 = shalt.err (!%p1612_p12)
}
  0x2f   : > { %s2282_s6 = sld [smem:[#allocation31_spill]]  ;;  %s1311_s22 = sadd.s32 4294967294, %s1844_s18  }
  0x30   : > { %s43_s24 = sadd.s32 1, %s1840_s17  ;;  %s52_s26 = sadd.s32 1, %s1832_s15 }
  0x31   : > { %p45_p13 = scmp.ge.s32.totalorder %s43_s24, 2  ;;  %p59_p0 = scmp.ne.s32.totalorder %s1832_s15, %s1828_s14 }
  0x32   : > { %p60_p2 = scmp.eq.s32.totalorder %s1844_s18, 0  ;;  %p65_p8 = scmp.ne.s32.totalorder %s1828_s14, %s1824_s13 }
  0x33   : > { %s2319_s24 = smov (%p45_p13, %s43_s24), 0  ;;  %p297_p9 = scmp.eq.s32.totalorder %s1945_s19, 1 }
  0x34   : > { %2283 = sst [smem:[#allocation25_spill]] %s2319_s24  ;;  %p1995_p4 = por %p60_p2, %p59_p0 }
  0x35   : > { %1473 = dma.hbm_to_vmem [thread:$0]  (!%p1959_p6), %s2282_s6, 512, %s349_s25, [#allocation14], %s2255_s27, %s2255_s27, %s2257_s28  }
  0x36   : > { %s47_s25 = ssub.s32 %s1840_s17, %s2319_s24  ;;  %p2006_p11 = por %p2259_p1, %p65_p8 }
  0x37   : > { %p50_p10 = scmp.eq.s32.totalorder %s47_s25, 0  ;;  %p2010_p12 = por %p297_p9, %p59_p0 }
  0x38   : > { %p303_p13 = scmp.eq.s32.totalorder %s1311_s22, 1  ;;  %p1495_p5 = scmp.lt.s32.totalorder %s1844_s18, 2 }
  0x39   : > { %s2286_s11 = scalar_select %p2010_p12, 1, 0 }
  0x3a   : > { %s2015_s12 = scalar_select %p50_p10, %s1832_s15, %s52_s26  }
  0x3b   : > { %p2017_p2 = por %p303_p13, %p65_p8  ;;  %s2023_s27 = sand.u32 1, %s1832_s15  }
  0x3c   : > { %2287 = sst [smem:[#allocation26_spill]] %s2015_s12  ;;  %s1319_s25 = sshll.u32 %s1840_s17, 7 }
  0x3d   : > { %s2288_s21 = scalar_select %p2017_p2, 1, 0 }
  0x3e   : > { %s2268_s28 = sshll.u32 %s2023_s27, 3  ;;  %p2029_p1 = pnand %p1495_p5, %p1995_p4 }
  0x3f   : > { %2289 = sst [smem:[#allocation27_spill]] %s2288_s21  ;;  %s400_s22 = sand.u32 1, %s1844_s18  }
  0x40   : > { %s2291_s1 = sld [smem:[#allocation28_spill]]  ;;  %s404_s12 = scalar_lea.vmem [#allocation7], %s2268_s28 }
  0x41   : > { %s411_s15 = sshll.u32 %s404_s12, 4  ;;  %s2041_s21 = scalar_lea.sflag [#allocation8], %s400_s22  ;;  %s412_s15 = int_to_ptr.vmem [resolvable:$true] %s411_s15 }
  0x42   : > { %p2269_p0 = pneg %p2029_p1  ;;  %s1629_s29 = scalar_lea.vmem %s412_s15, 128 }
  0x43   : > { %p1630_p5 = scmp.ne.s32.totalorder %s412_s15, %s1629_s29  ;;  %s1850_s18 = smov [#allocation7]  }
  0x44   : > { %s1634_s13 = sshll.u32 %s1850_s18, 4  ;;  %s1635_s13 = int_to_ptr.vmem [resolvable:$false] %s1634_s13 }
  0x45   : > { %p1632_p4 = pnand %p1630_p5, %p2269_p0  ;;  %s1636_s10 = scalar_lea.vmem %s1635_s13, 256 }
  0x46   : > { %s409_s24 = scalar_lea.hbm %s2291_s1, %s1319_s25  ;;  %p1637_p9 = scmp.lt.s32.totalorder %s412_s15, %s1635_s13 }
  0x47   : > { %p1633_p8 = pneg %p1632_p4  ;;  %p1638_p10 = scmp.lt.s32.totalorder %s1636_s10, %s1629_s29 }
  0x49   : > { %p1639_p13 = por %p1638_p10, %p1637_p9 }
  0x4b   : > { %p1640_p7 = pnand %p1639_p13, %p1633_p8 }
  0x4d   : > { %1643 = shalt.err (!%p1640_p7)
}
  0x4e   : > { %1483 = dma.hbm_to_vmem [thread:$0]  (!%p2029_p1), %s409_s24, 128, %s412_s15, %s2041_s21  }
  0x4f   : > { %s1851_s6 = smov [#allocation12]   ;;  %s1852_s22 = smov [#allocation15]  }
  0x50   : > { %s335_s12 = sshll.u32 %s1851_s6, 4  ;;  %s361_s26 = sshll.u32 %s1852_s22, 4  ;;  %s336_s12 = int_to_ptr.vmem [resolvable:$true] %s335_s12  ;;  %s362_s26 = int_to_ptr.vmem [resolvable:$true] %s361_s26 }
  0x51   : > { %s1655_s28 = scalar_lea.vmem %s336_s12, 512  ;;  %p2292_p4 = pneg %p1959_p6 }
  0x52   : > { %p1656_p5 = scmp.ne.s32.totalorder %s336_s12, %s1655_s28  ;;  %p1663_p12 = scmp.lt.s32.totalorder %s336_s12, %s336_s12 }
  0x53   : > { %p1664_p9 = scmp.lt.s32.totalorder %s1655_s28, %s1655_s28 }
  0x54   : > { %p1658_p0 = pnand %p1656_p5, %p2292_p4 }
  0x55   : > { %p1665_p8 = por %p1664_p9, %p1663_p12 }
  0x56   : > { %p1659_p2 = pneg %p1658_p0 }
  0x58   : > { %p1666_p7 = pnand %p1665_p8, %p1659_p2 }
  0x5a   : > { %1669 = shalt.err (!%p1666_p7)
}
  0x5b   : > { %s2293_s10 = smov 8   ;;  %s2294_s13 = smov 128  }
  0x5c   : > { %s2295_s5 = sld [smem:[#allocation30_spill]]  ;;  %s1681_s24 = scalar_lea.vmem %s362_s26, 512 }
  0x5d   : > { %p1682_p10 = scmp.ne.s32.totalorder %s362_s26, %s1681_s24  ;;  %p2296_p0 = pmov %p2292_p4 }
  0x5e   : > { %p1689_p12 = scmp.lt.s32.totalorder %s362_s26, %s362_s26  ;;  %p1690_p2 = scmp.lt.s32.totalorder %s1681_s24, %s1681_s24 }
  0x5f   : > { %p1684_p13 = pnand %p1682_p10, %p2296_p0 }
  0x60   : > { %p1691_p4 = por %p1690_p2, %p1689_p12 }
  0x61   : > { %p1685_p5 = pneg %p1684_p13 }
  0x62   : > { %1470 = dma.hbm_to_vmem [thread:$0]  (!%p1959_p6), %s2295_s5, 512, %s336_s12, [#allocation11], %s2294_s13, %s2294_s13, %s2293_s10  }
  0x63   : > { %p1692_p9 = pnand %p1691_p4, %p1685_p5 }
  0x65   : > { %1695 = shalt.err (!%p1692_p9)
}
  0x66   : > { %1476 = dma.hbm_to_vmem [thread:$0]  (!%p1959_p6), %s2251_s7, 512, %s362_s26, [#allocation14], %s2294_s13, %s2294_s13, %s2293_s10  }
  0x67   : > { %s391_s22 = scalar_lea.hbm %s2244_s0, %s1319_s25  ;;  %s2297_s15 = sshll.u32 %s2023_s27, 3 }
  0x68   : > { %s385_s18 = scalar_lea.vmem [#allocation4], %s2297_s15  ;;  %s1322_s24 = sshll.u32 %s1840_s17, 4 }
  0x69   : > { %s393_s23 = sshll.u32 %s385_s18, 4  ;;  %s382_s1 = scalar_lea.sflag [#allocation5], %s2023_s27  ;;  %s394_s23 = int_to_ptr.vmem [resolvable:$true] %s393_s23 }
  0x6a   : > { %s1709_s5 = scalar_lea.vmem %s394_s23, 128  ;;  %p2298_p7 = pneg %p2029_p1 }
  0x6b   : > { %p1710_p8 = scmp.ne.s32.totalorder %s394_s23, %s1709_s5  ;;  %s1853_s28 = smov [#allocation4]  }
  0x6c   : > { %s1714_s29 = sshll.u32 %s1853_s28, 4  ;;  %s1715_s29 = int_to_ptr.vmem [resolvable:$false] %s1714_s29 }
  0x6d   : > { %p1712_p10 = pnand %p1710_p8, %p2298_p7  ;;  %s1716_s26 = scalar_lea.vmem %s1715_s29, 256 }
  0x6e   : > { %p1717_p6 = scmp.lt.s32.totalorder %s394_s23, %s1715_s29  ;;  %p1718_p13 = scmp.lt.s32.totalorder %s1716_s26, %s1709_s5 }
  0x6f   : > { %p1713_p0 = pneg %p1712_p10 }
  0x70   : > { %p1719_p5 = por %p1718_p13, %p1717_p6 }
  0x72   : > { %p1720_p12 = pnand %p1719_p5, %p1713_p0 }
  0x74   : > { %1723 = shalt.err (!%p1720_p12)
}
  0x75   : > { %1480 = dma.hbm_to_vmem [thread:$0]  (!%p2029_p1), %s391_s22, 128, %s394_s23, %s382_s1  }
  0x76   : > { %s426_s13 = scalar_lea.hbm %s2246_s2, %s1322_s24  ;;  %s421_s6 = scalar_lea.vmem [#allocation9], %s2023_s27 }
  0x77   : > { %s428_s12 = sshll.u32 %s421_s6, 4  ;;  %p2299_p4 = pmov %p2298_p7  ;;  %s429_s12 = int_to_ptr.vmem [resolvable:$true] %s428_s12 }
  0x78   : > { %s1737_s15 = scalar_lea.vmem %s429_s12, 16  ;;  %s1854_s5 = smov [#allocation9]  }
  0x79   : > { %p1738_p2 = scmp.ne.s32.totalorder %s429_s12, %s1737_s15  ;;  %s1742_s18 = sshll.u32 %s1854_s5, 4  ;;  %s1743_s18 = int_to_ptr.vmem [resolvable:$false] %s1742_s18 }
  0x7a   : > { %s1744_s28 = scalar_lea.vmem %s1743_s18, 32  ;;  %p1745_p7 = scmp.lt.s32.totalorder %s429_s12, %s1743_s18 }
  0x7b   : > { %p1740_p9 = pnand %p1738_p2, %p2299_p4  ;;  %p1746_p10 = scmp.lt.s32.totalorder %s1744_s28, %s1737_s15 }
  0x7d   : > { %p1741_p8 = pneg %p1740_p9  ;;  %p1747_p0 = por %p1746_p10, %p1745_p7 }
  0x7f   : > { %p1748_p6 = pnand %p1747_p0, %p1741_p8 }
  0x81   : > { %1751 = shalt.err (!%p1748_p6)
}
  0x82   : > { %1486 = dma.hbm_to_vmem [thread:$0]  (!%p2029_p1), %s426_s13, 16, %s429_s12, %s2041_s21  }
  0x83   : > { %447 = sbr.rel (%p1950_p3) target bundleno = 1274 (0x4fa), region = 60  ;;  %s2100_s1 = sand.u32 (!%p1950_p3), 1, %s1828_s14  }
  0x84   : > { %s2103_s27 = sshll.u32 (!%p1950_p3), %s2100_s1, 3  ;;  %s450_s22 = scalar_lea.sflag (!%p1950_p3), [#allocation5], %s2100_s1 }
  0x85   : > { %s453_s23 = scalar_lea.vmem (!%p1950_p3), [#allocation4], %s2103_s27 }
  0x88   : > { %1803 = dma.done.wait (%p2006_p11), %s450_s22, 128  }
  0x89   : > { %1805 = vsyncadd (%p2006_p11), %s450_s22, 4294967168  ;;  %s458_s4 = sand.u32 1, %s1945_s19   ;;  %s462_s21 = scalar_lea.vmem [#allocation7], %s2103_s27 }
  0x8a   : > { %s459_s20 = scalar_lea.sflag [#allocation8], %s458_s4 }
  0x8b   : > { %1807 = dma.done.wait (%p2006_p11), %s459_s20, 144  }
  0x8c   : > { %1809 = vsyncadd (%p2006_p11), %s459_s20, 4294967152  ;;  %s470_s24 = scalar_lea.vmem [#allocation9], %s2100_s1  ;;  %p2300_p1 = scmp.eq.s32.totalorder %s1945_s19, 0 }
  0x8e   : > { %1811 = dma.done.wait (%p2300_p1), [#allocation11], 1024   ;;  %p2301_p3 = pmov %p2300_p1 }
  0x8f   : > { %p2302_p13 = pmov %p2300_p1 }
  0x90   : > { %1813 = vsyncadd (%p2301_p3), [#allocation11], 4294966272 }
  0x91   : > { %1815 = dma.done.wait (%p2302_p13), [#allocation14], 1024   ;;  %p2303_p5 = pmov %p2300_p1 }
  0x92   : > { %v1855_v0 = vmov 0.0   ;;  %vm1856_vm0 = vmmov 0   ;;  %v554_v1 = vld [vmem:[#allocation12 + $0x18] sm:$0xff]  ;;  %v553_v2 = vld [vmem:[#allocation12 + $0x10] sm:$0xff]  ;;  %v552_v3 = vld [vmem:[#allocation12 + $0x8] sm:$0xff]  ;;  %vm555_vm1 = vcmask 261120  }
  0x93   : > { %1817 = vsyncadd (%p2303_p5), [#allocation14], 4294966272  ;;  %1375 = vmatprep.subr.mxu0 %v1855_v0  ;;  %1383 = vmatprep.mubr.msk.f32.mxu0 %vm1856_vm0, %v1855_v0  ;;  %v551_v4 = vld [vmem:[#allocation12] sm:$0xff]  ;;  %v550_v5 = vld [vmem:[%s462_s21] sm:$0xff]  ;;  %vm868_vm2 = vcmask 64512   ;;  %p539_p11 = scmp.lt.s32.totalorder %s1836_s16, 1 }
  0x94   : > { %1386 = vmatprep.subr.mxu1 %v1855_v0  ;;  %1394 = vmatprep.mubr.msk.f32.mxu1 %vm1856_vm0, %v1855_v0  ;;  %v709_v6 = vld [vmem:[#allocation10 + $0x18] sm:$0xff]  ;;  %v708_v7 = vld [vmem:[#allocation10 + $0x10] sm:$0xff]  ;;  %v707_v8 = vld [vmem:[#allocation10 + $0x8] sm:$0xff]  ;;  %v1857_v34 = vmov 0   ;;  %s1343_s4 = sshll.u32 %s1836_s16, 7  ;;  %s538_s20 = scalar_lea.vmem [#allocation16], %s2103_s27 }
  0x95   : > { %1376 = vmatpush3.msra.mxu0 %v554_v1  ;;  %v706_v9 = vld [vmem:[#allocation10] sm:$0xff]  ;;  %v633_v11 = vld [vmem:[#allocation13 + $0x18] sm:$0xff]  ;;  %v632_v12 = vld [vmem:[#allocation13 + $0x10] sm:$0xff]  ;;  %1558 = vset.pattern.permute.xlu1 %v1857_v34  ;;  %s540_s25 = scalar_select %p539_p11, %s1836_s16, 1 }
  0x96   : > { %1377 = vmatprep.subr.mxu0 %v1855_v0  ;;  %v2143_v10 = vld [vmem:[%s453_s23] sm:$0xff]  ;;  %1387 = vmatpush3.msra.mxu1 %v633_v11  ;;  %v1335_v23 = vld [vmem:[%s470_s24] ss:$0 sm:$0xff]  ;;  %v966_v36 = vld [vmem:[%s2252_s8 + $0x8] sm:$0xff]  ;;  %s1137_s21 = sshll.u32 %s538_s20, 4  ;;  %s2304_s30 = sld [smem:[#allocation32_spill]]  ;;  %s1138_s21 = int_to_ptr.vmem [resolvable:$true] %s1137_s21 }
  0x97   : > { %1378 = vmatpush3.msra.mxu0 %v553_v2  ;;  %1388 = vmatprep.subr.mxu1 %v1855_v0  ;;  %v631_v13 = vld [vmem:[#allocation13 + $0x8] sm:$0xff]  ;;  %v630_v14 = vld [vmem:[#allocation13] sm:$0xff]  ;;  %s1331_s6 = sshll.u32 %s540_s25, 3  ;;  %v964_v41 = vld [vmem:[#allocation15 + $0x18] sm:$0xff]  ;;  %s1123_s26 = scalar_lea.sflag [#allocation6], %s2100_s1 }
  0x98   : > { %1379 = vmatprep.subr.mxu0 %v1855_v0  ;;  %1389 = vmatpush3.msra.mxu1 %v632_v12  ;;  %v968_v33 = vld [vmem:[%s2252_s8 + $0x18] sm:$0xff]  ;;  %v967_v35 = vld [vmem:[%s2252_s8 + $0x10] sm:$0xff]  ;;  %s545_s5 = scalar_lea.vmem %s2247_s3, %s1331_s6  ;;  %v963_v42 = vld [vmem:[#allocation15 + $0x10] sm:$0xff]  ;;  %s1752_s25 = scalar_lea.vmem %s1138_s21, 128 }
  0x99   : > { %1380 = vmatpush3.msra.mxu0 %v552_v3  ;;  %1390 = vmatprep.subr.mxu1 %v1855_v0  ;;  %v954_v37 = vld [vmem:[%s545_s5] sm:$0xff]  ;;  %v961_v45 = vld [vmem:[#allocation15] sm:$0xff]  ;;  %p1753_p12 = scmp.ne.s32.totalorder %s1138_s21, %s1752_s25  ;;  %p2305_p2 = scmp.ne.s32.totalorder %s2286_s11, 0 }
  0x9a   : > { %1381 = vmatprep.subr.mxu0 %v1855_v0  ;;  %1391 = vmatpush3.msra.mxu1 %v631_v13  ;;  %v962_v43 = vld [vmem:[#allocation15 + $0x8] sm:$0xff]  ;;  %s1858_s10 = smov [#allocation16]  }
  0x9b   : > { %1382 = vmatpush3.msra.mxu0 %v551_v4  ;;  %1392 = vmatprep.subr.mxu1 %v1855_v0  ;;  %v965_v44 = vld [vmem:[%s2252_s8] sm:$0xff]  ;;  %p1754_p4 = pnand %p1753_p12, %p2305_p2  ;;  %s1756_s13 = sshll.u32 %s1858_s10, 4  ;;  %s1757_s13 = int_to_ptr.vmem [resolvable:$false] %s1756_s13 }
  0x9c   : > { %1384 = vmatmul.mubr.msk.f32.vlgmr.msra.gmra.mxu0 %vm555_vm1, %v550_v5  ;;  %1397 = vmatprep.subr.mxu0 %v1855_v0  ;;  %v1341_v53 = vld [vmem:[%s2253_s9] ss:$0 sm:$0xff]  ;;  %s1135_s29 = scalar_lea.hbm %s2304_s30, %s1343_s4  ;;  %s1758_s16 = scalar_lea.vmem %s1757_s13, 256 }
  0x9d   : > { %1398 = vmatpush3.msra.mxu0 %v709_v6  ;;  %1405 = vmatprep.mubr.msk.f32.mxu0 %vm1856_vm0, %v1855_v0  ;;  %p1755_p9 = pneg %p1754_p4  ;;  %p1759_p8 = scmp.lt.s32.totalorder %s1138_s21, %s1757_s13 }
  0x9e   : > { %1399 = vmatprep.subr.mxu0 %v1855_v0  ;;  %1393 = vmatpush3.msra.mxu1 %v630_v14  ;;  %p1760_p7 = scmp.lt.s32.totalorder %s1758_s16, %s1752_s25 }
  0x9f   : > { %1400 = vmatpush3.msra.mxu0 %v708_v7  ;;  %1395 = vmatmul.mubr.msk.f32.vlgmr.msra.gmra.mxu1 %vm555_vm1, %v550_v5 }
  0xa0   : > { %1401 = vmatprep.subr.mxu0 %v1855_v0  ;;  %1408 = vmatprep.subr.mxu1 %v1855_v0  ;;  %p1761_p10 = por %p1760_p7, %p1759_p8 }
  0xa1   : > { %1402 = vmatpush3.msra.mxu0 %v707_v8  ;;  %1410 = vmatprep.mubr.msk.f32.mxu1 %vm1856_vm0, %v1855_v0 }
  0xa2   : > { %1403 = vmatprep.subr.mxu0 %v1855_v0  ;;  %1559 = vset.pattern.permute.xlu0 %v1857_v34  ;;  %p1762_p0 = pnand %p1761_p10, %p1755_p9 }
  0xa3   : > { %1404 = vmatpush3.msra.mxu0 %v706_v9  ;;  %957 = vperm.xlu1 %1558, %v954_v37  }
  0xa4   : > { %1406 = vmatmul.mubr.msk.f32.vlgmr.msra.gmra.mxu0 %vm555_vm1, %v2143_v10  ;;  %1418 = vmatprep.subr.mxu0 %v1855_v0 }
  0xa5   : > { %1426 = vmatprep.mubr.msk.f32.mxu0 %vm1856_vm0, %v1855_v0  ;;  %1419 = vmatpush3.msra.mxu0 %v968_v33 }
  0xa6   : > { %1420 = vmatprep.subr.mxu0 %v1855_v0 }
  0xa7   : > { %1421 = vmatpush3.msra.mxu0 %v967_v35 }
  0xa8   : > { %1422 = vmatprep.subr.mxu0 %v1855_v0 }
  0xa9   : > { %1423 = vmatpush3.msra.mxu0 %v966_v36 }
  0xaa   : > { %1424 = vmatprep.subr.mxu0 %v1855_v0 }
  0xab   : > { %1425 = vmatpush3.msra.mxu0 %v965_v44 }
  0xac   : > { %1427 = vmatmul.mubr.msk.f32.vlgmr.msra.gmra.mxu0 %vm555_vm1, %v2143_v10 }
 0x11e   : > { %v958_v46 = vpop.permute.xlu1 %957 }
 0x15c   : > { %v625_v15 = vpop.f32.mrf.mxu0 }
 0x15d   : > { %629 = vst.msk [vmem:[#allocation2] sm:$0xff] %vm555_vm1, %v625_v15 }
 0x15e   : > { %v1385_v16 = vpop.f32.mrf.mxu0 }
 0x15f   : > { %v700_v20 = vpop.f32.mrf.mxu1 }
 0x160   : > { %704 = vst.msk [vmem:[#allocation3] sm:$0xff] %vm555_vm1, %v700_v20 }
 0x161   : > { %v1396_v21 = vpop.f32.mrf.mxu1 }
 0x164   : > { %v784_v17 = vld [vmem:[#allocation2] sm:$0xff]  ;;  %v780_v18 = vpop.f32.mrf.mxu0 }
 0x165   : > { %1409 = vmatpush3.xpose.msk.msra.mxu1 %vm555_vm1, %v784_v17 }
 0x166   : > { %v1407_v19 = vpop.f32.mrf.mxu0  ;;  %1413 = vmatprep.subr.mxu1 %v1855_v0 }
 0x167   : > { %v880_v22 = vld [vmem:[#allocation3] sm:$0xff] }
 0x168   : > { %1411 = vmatmul.mubr.msk.f32.vlgmr.msra.gmra.mxu1 %vm555_vm1, %v780_v18 }
 0x169   : > { %1415 = vmatprep.mubr.msk.f32.mxu1 %vm1856_vm0, %v1855_v0  ;;  %1414 = vmatpush3.msra.mxu1 %v880_v22 }
 0x16a   : > { %1429 = vmatprep.subr.mxu1 %v1855_v0 }
 0x16c   : > { %v1035_v50 = vpop.f32.mrf.mxu0 }
 0x16e   : > { %v1428_v51 = vpop.f32.mrf.mxu0 }
 0x228   : > { %v864_v24 = vpop.f32.mrf.mxu1 }
 0x229   : > { %v865_v25 = vadd.f32 %v1335_v23, %v864_v24 }
 0x22a   : > { %v1412_v26 = vpop.f32.mrf.mxu1 }
 0x22b   : > { %v869_v27 = vsel %vm868_vm2, %v865_v25, -inf }
 0x22c   : > { %870 = vmax.xlane.f32.xlu0 %v869_v27 }
 0x2b5   : > { %v871_v28 = vpop.xlane.xlu0 %870 }
 0x2b6   : > { %v872_v29 = vsub.f32 %v865_v25, %v871_v28 }
 0x2b8   : > { %v873_v30 = vmul.f32 1.442695, %v872_v29 }
 0x2ba   : > { %1560 = vpow2.f32 %v873_v30 }
 0x2c7   : > { %v1561_v31 = vpop.eup %1560 }
 0x2c8   : > { %v875_v32 = vsel %vm868_vm2, %v1561_v31, 0.0 }
 0x2c9   : > { %876 = vadd.xlane.f32.xlu0 %v875_v32 }
 0x352   : > { %v877_v38 = vpop.xlane.xlu0 %876 }
 0x353   : > { %1562 = vrcp.f32 %v877_v38 }
 0x360   : > { %v1563_v39 = vpop.eup %1562 }
 0x361   : > { %v879_v40 = vmul.f32 %v1563_v39, %v1561_v31 }
 0x363   : > { %1416 = vmatmul.mubr.msk.f32.vlgmr.msra.gmra.mxu1 %vm868_vm2, %v879_v40 }
 0x364   : > { %1430 = vmatpush3.msra.mxu1 %v964_v41  ;;  %1437 = vmatprep.mubr.msk.f32.mxu1 %vm1856_vm0, %v1855_v0 }
 0x365   : > { %1431 = vmatprep.subr.mxu1 %v1855_v0 }
 0x366   : > { %1432 = vmatpush3.msra.mxu1 %v963_v42 }
 0x367   : > { %1433 = vmatprep.subr.mxu1 %v1855_v0 }
 0x368   : > { %1434 = vmatpush3.msra.mxu1 %v962_v43 }
 0x369   : > { %1435 = vmatprep.subr.mxu1 %v1855_v0 }
 0x36a   : > { %1436 = vmatpush3.msra.mxu1 %v961_v45 }
 0x423   : > { %v950_v47 = vpop.f32.mrf.mxu1 }
 0x424   : > { %v960_v48 = vmul.f32 %v958_v46, %v950_v47 }
 0x425   : > { %v1417_v49 = vpop.f32.mrf.mxu1 }
 0x426   : > { %1438 = vmatmul.mubr.msk.f32.vlgmr.msra.gmra.mxu1 %vm555_vm1, %v960_v48 }
 0x4e6   : > { %v1108_v52 = vpop.f32.mrf.mxu1 }
 0x4e7   : > { %v1109_v54 = vadd.f32 %v1108_v52, %v1035_v50 }
 0x4e8   : > { %v1439_v55 = vpop.f32.mrf.mxu1 }
 0x4e9   : > { %v1119_v56 = vadd.f32 %v1341_v53, %v1109_v54 }
 0x4eb   : > { %v1120_v57 = vmax.f32 %v1119_v56, 0.0 }
 0x4ed   : > { %1121 = vst.msk [vmem:[%s538_s20] sm:$0xff] %vm555_vm1, %v1120_v57 }
 0x4ee   : > { %1765 = shalt.err (!%p1762_p0)
}
 0x4ef   : > { %s1766_s27 = scalar_lea.hbm %s1135_s29, 128  ;;  %s1770_s12 = scalar_lea.hbm %s2304_s30, 256 }
 0x4f0   : > { %p1767_p6 = scmp.ne.s32.totalorder %s1135_s29, %s1766_s27  ;;  %p1771_p13 = scmp.lt.s32.totalorder %s1135_s29, %s2304_s30 }
 0x4f1   : > { %p1772_p5 = scmp.lt.s32.totalorder %s1770_s12, %s1766_s27 }
 0x4f2   : > { %p1768_p1 = pnand %p1767_p6, %p2305_p2 }
 0x4f3   : > { %p1773_p11 = por %p1772_p5, %p1771_p13 }
 0x4f4   : > { %p1769_p3 = pneg %p1768_p1 }
 0x4f6   : > { %p1774_p12 = pnand %p1773_p11, %p1769_p3 }
 0x4f8   : > { %1777 = shalt.err (!%p1774_p12)
}
 0x4f9   : > { %1462 = dma.vmem_to_hbm [thread:$0]  (%p2305_p2), %s1138_s21, 128, %s1135_s29, %s1123_s26  }
 0x4fa PF: > { %s2306_s18 = sld [smem:[#allocation22_spill]] }
 0x4fb   : > { %s2307_s28 = sld [smem:[#allocation27_spill]] }
 0x4fc   : > { %s2308_s22 = sld [smem:[#allocation24_spill]] }
 0x500   : > { %s1149_s23 = sand.u32 1, %s2306_s18  }
 0x501   : > { %p2309_p4 = scmp.ne.s32.totalorder %s2307_s28, 0  ;;  %s1150_s4 = scalar_lea.sflag [#allocation6], %s1149_s23 }
 0x502   : > { %p2310_p9 = scmp.ge.s32.totalorder %s2308_s22, 2 }
 0x504   : > { %p1488_p8 = pnand %p2310_p9, %p2309_p4 }
 0x506   : > { %p1489_p7 = pneg %p1488_p8 }
 0x508   : > { %1819 = dma.done.wait (%p1489_p7), %s1150_s4, 128  }
 0x509   : > { %1821 = vsyncadd (%p1489_p7), %s1150_s4, 4294967168  ;;  %s31_s18 = sadd.s32 1, %s2308_s22   ;;  %s2311_s20 = sld [smem:[#allocation23_spill]] }
 0x50a   : > { %p28_p10 = scmp.ge.s32.totalorder %s31_s18, 4   ;;  %s2312_s15 = sld [smem:[#allocation26_spill]] }
 0x50b   : > { %s2313_s11 = sld [smem:[#allocation25_spill]]  ;;  %s2314_s13 = smov %s1828_s14 }
 0x50c   : > { %s2316_s16 = smov %s1840_s17 }
 0x50d   :  { %30 = sbr.rel (!%p28_p10) target bundleno = 16 (0x10), region = 152 }
 0x50f   : > { %s2315_s14 = smov %s2311_s20 }
 0x511   : > { %s2317_s17 = smov %s2313_s11 }
 0x512   :  { %1155 = vsyncpa [#allocation5], 1 }
 0x513   :  { %1157 = vsyncpa [#allocation5 + $0x1], 1 }
 0x514   :  { %1158 = vsyncpa [#allocation8], 1 }
 0x515   :  { %1160 = vsyncpa [#allocation8 + $0x1], 1 }
 0x516   :  { %1161 = vsyncpa [#allocation11], 1 }
 0x517   :  { %1162 = vsyncpa [#allocation14], 1 }
 0x518   :  { %1163 = vsyncpa [#allocation6], 1 }
 0x519   :  { %1165 = vsyncpa [#allocation6 + $0x1], 1 }

</bundles_post_ra>
